<compile_context>
chip_gen: v7x
topology: tpu7x:2x2x1
jax: 0.10.0
libtpu: 0.0.40
codegen_flags: <defaults>
</compile_context>

<pallas_src>
import functools

import jax
import jax.numpy as jnp
from jax.experimental import pallas as pl
from jax.experimental.pallas import tpu as pltpu

_MIB = 1 << 20


# ---------------------------------------------------------------------------
# Kernels
# ---------------------------------------------------------------------------

def ffn_kernel_single(x_ref, w1_ref, b1_ref, w2_ref, b2_ref, o_ref):
    """Fast path: whole d_ff in one step (no accumulator RMW traffic)."""
    h = jnp.dot(x_ref[...], w1_ref[...], preferred_element_type=jnp.float32)
    h = jnp.maximum(h + b1_ref[...].astype(jnp.float32), 0.0)   # bias + ReLU
    # dropout (eval mode) == identity
    h = h.astype(w2_ref.dtype)                 # single cast before second dot
    out = jnp.dot(h, w2_ref[...], preferred_element_type=jnp.float32)
    o_ref[...] = (out + b2_ref[...].astype(jnp.float32)).astype(o_ref.dtype)


def ffn_kernel_tiled(x_ref, w1_ref, b1_ref, w2_ref, b2_ref, o_ref, acc_ref):
    """d_ff streamed in tf-wide tiles with a resident f32 accumulator."""
    j = pl.program_id(1)  # d_ff (reduction) axis, last in the grid

    @pl.when(j == 0)
    def _():
        # Fold the b2 add into accumulator init: removes one (tm, d_model)
        # VPU pass + broadcast from the epilogue critical path.
        acc_ref[...] = jnp.broadcast_to(
            b2_ref[...].astype(jnp.float32), acc_ref.shape)

    # First matmul (MXU) for this d_ff tile; f32 accumulation.
    h = jnp.dot(x_ref[...], w1_ref[...], preferred_element_type=jnp.float32)
    h = jnp.maximum(h + b1_ref[...].astype(jnp.float32), 0.0)   # bias + ReLU
    # dropout (eval mode) == identity
    h = h.astype(w2_ref.dtype)                 # single cast before second dot

    # Second matmul: accumulate this tile's (tm, d_model) contribution in f32.
    acc_ref[...] += jnp.dot(h, w2_ref[...], preferred_element_type=jnp.float32)

    @pl.when(j == pl.num_programs(1) - 1)
    def _():
        o_ref[...] = acc_ref[...].astype(o_ref.dtype)


# ---------------------------------------------------------------------------
# Tile / VMEM budgeting
# ---------------------------------------------------------------------------

def _physical_vmem_bytes():
    """Per-TensorCore VMEM (128 MiB v5e/v6e, 64 MiB v7x); conservative fallback."""
    try:
        info = pltpu.get_tpu_info()
        cap = getattr(info, "vmem_capacity_bytes", None)
        if cap:
            return int(cap)
    except Exception:
        pass
    return 64 * _MIB  # conservative: assume v7x-sized VMEM


def _working_set_bytes(tm, tf, d_model, x_bytes, w_bytes, out_bytes):
    """Estimate VMEM working set: 2x double-buffered tiles + scratch."""
    ws = 2 * tm * d_model * x_bytes          # x row tile
    ws += 2 * d_model * tf * w_bytes         # W1 ff tile
    ws += 2 * tf * d_model * w_bytes         # W2 ff tile
    ws += 2 * tf * 4 + 2 * d_model * 4       # b1 / b2 tiles
    ws += 2 * tm * d_model * out_bytes       # output tile
    ws += tm * d_model * 4                   # f32 accumulator scratch
    ws += tm * tf * 4                        # f32 intermediate h
    return ws


def _select_tiles(m_padded, d_model, d_ff, x_bytes, w_bytes, out_bytes, budget):
    ws = functools.partial(_working_set_bytes, d_model=d_model, x_bytes=x_bytes,
                           w_bytes=w_bytes, out_bytes=out_bytes)
    tf_cands = sorted(
        {c for c in (d_ff, 2048, 1024, 512, 256, 128)
         if 0 < c <= d_ff and d_ff % c == 0 and (c % 128 == 0 or c == d_ff)},
        reverse=True)
    tm_cands = sorted(
        {c for c in (1024, 768, 512, 384, 256, 128, 64, 32, 16, 8, m_padded)
         if 0 < c <= m_padded and c % 8 == 0},
        reverse=True)

    # Keep a reasonable tf floor so tm maximization doesn't degenerate to
    # ultra-thin ff tiles (accumulator RMW per step is tf-independent).
    tf_floor_cands = [c for c in tf_cands if c >= 256]
    tf_floor = tf_floor_cands[-1] if tf_floor_cands else tf_cands[-1]

    # 1) tm is the biggest lever: weight HBM traffic ~ (M/tm) * (|W1|+|W2|).
    tm = tm_cands[-1]
    for c in tm_cands:
        if ws(c, tf_floor) <= budget:
            tm = c
            break
    # 2) then fatten tf within the remaining budget (fewer, fatter j steps).
    tf = tf_floor
    for c in tf_cands:
        if ws(tm, c) <= budget:
            tf = c
            break
    return tm, tf


# ---------------------------------------------------------------------------
# Wrapper
# ---------------------------------------------------------------------------

def feed_forward_pallas(x2d, w1, b1, w2, b2, *, tm=None, tf=None,
                        vmem_limit_bytes=None):
    """FFN forward: relu(x @ w1 + b1) @ w2 + b2   (dropout = eval-mode identity).

    x2d: (M, d_model); w1: (d_model, d_ff); b1: (d_ff,)/(1, d_ff);
    w2: (d_ff, d_model); b2: (d_model,)/(1, d_model).
    Weights are (in_features, out_features) = transpose of nn.Linear.weight.
    For the production hot path pass x/w1/w2 as bf16 (f32 accumulation is kept
    inside the kernel); biases may stay f32.
    """
    M, d_model = x2d.shape
    d_ff = w1.shape[1]
    assert w1.shape == (d_model, d_ff)
    assert w2.shape == (d_ff, d_model)
    b1 = b1.reshape(1, d_ff)
    b2 = b2.reshape(1, d_model)

    x_bytes = x2d.dtype.itemsize
    w_bytes = w1.dtype.itemsize
    out_bytes = x_bytes

    # Per-generation VMEM budget; always pass an explicit vmem_limit_bytes.
    physical = _physical_vmem_bytes()
    budget = int(physical * 0.85)

    m_padded = pl.cdiv(M, 8) * 8  # sublane multiple
    auto_tm, auto_tf = _select_tiles(m_padded, d_model, d_ff,
                                     x_bytes, w_bytes, out_bytes, budget)
    tm = auto_tm if tm is None else min(tm, m_padded)
    tf = auto_tf if tf is None else min(tf, d_ff)
    assert d_ff % tf == 0, (d_ff, tf)
    assert tm % 8 == 0, (tm,)

    # Ragged row counts: zero-pad rows rather than asserting; slice back after.
    m_final = pl.cdiv(M, tm) * tm
    x_in = x2d if m_final == M else jnp.pad(x2d, ((0, m_final - M), (0, 0)))

    if vmem_limit_bytes is None:
        ws = _working_set_bytes(tm, tf, d_model, x_bytes, w_bytes, out_bytes)
        vmem_limit_bytes = int(min(max(ws * 1.25, 32 * _MIB), physical * 0.92))

    n_row = m_final // tm
    n_ff = d_ff // tf

    if n_ff == 1:
        # Fast path: weights VMEM-resident across the whole row loop.
        grid_spec = pltpu.PrefetchScalarGridSpec(
            num_scalar_prefetch=0,
            grid=(n_row,),
            in_specs=[
                pl.BlockSpec((tm, d_model), lambda i: (i, 0)),   # x row tile
                pl.BlockSpec((d_model, tf), lambda i: (0, 0)),   # W1 (whole)
                pl.BlockSpec((1, tf),       lambda i: (0, 0)),   # b1
                pl.BlockSpec((tf, d_model), lambda i: (0, 0)),   # W2 (whole)
                pl.BlockSpec((1, d_model),  lambda i: (0, 0)),   # b2
            ],
            out_specs=pl.BlockSpec((tm, d_model), lambda i: (i, 0)),
        )
        kernel = ffn_kernel_single
        dim_sem = (pltpu.PARALLEL,)          # row axis shards across TCs (v7x)
    else:
        grid_spec = pltpu.PrefetchScalarGridSpec(
            num_scalar_prefetch=0,
            grid=(n_row, n_ff),              # reduction (d_ff) axis last
            in_specs=[
                pl.BlockSpec((tm, d_model), lambda i, j: (i, 0)),   # x row tile
                pl.BlockSpec((d_model, tf), lambda i, j: (0, j)),   # W1 ff tile
                pl.BlockSpec((1, tf),       lambda i, j: (0, j)),   # b1 ff tile
                pl.BlockSpec((tf, d_model), lambda i, j: (j, 0)),   # W2 ff tile
                pl.BlockSpec((1, d_model),  lambda i, j: (0, 0)),   # b2
            ],
            out_specs=pl.BlockSpec((tm, d_model), lambda i, j: (i, 0)),
            scratch_shapes=[pltpu.VMEM((tm, d_model), jnp.float32)],
        )
        kernel = ffn_kernel_tiled
        dim_sem = (pltpu.PARALLEL, pltpu.ARBITRARY)

    out = pl.pallas_call(
        kernel,
        out_shape=jax.ShapeDtypeStruct((m_final, d_model), x2d.dtype),
        grid_spec=grid_spec,
        compiler_params=pltpu.CompilerParams(
            dimension_semantics=dim_sem,
            vmem_limit_bytes=vmem_limit_bytes,
        ),
    )(x_in, w1, b1, w2, b2)

    return out if m_final == M else out[:M]


def init_params(key, d_model, d_ff, dtype=jnp.float32):
    """Deterministic init mimicking nn.Linear default (U[-1/sqrt(fan_in), +])."""
    k1, k2, k3, k4 = jax.random.split(key, 4)
    bound1 = 1.0 / (d_model ** 0.5)
    bound2 = 1.0 / (d_ff ** 0.5)
    w1 = jax.random.uniform(k1, (d_model, d_ff), dtype, -bound1, bound1)
    b1 = jax.random.uniform(k2, (1, d_ff), dtype, -bound1, bound1)
    w2 = jax.random.uniform(k3, (d_ff, d_model), dtype, -bound2, bound2)
    b2 = jax.random.uniform(k4, (1, d_model), dtype, -bound2, bound2)
    return w1, b1, w2, b2


if __name__ == "__main__":
    key = jax.random.PRNGKey(0)
    kx, kp, kx2, kp2, kx3 = jax.random.split(key, 5)

    # ---- Test 1: small module shapes, float32, single-step fast path -------
    batch, seq, d_model, d_ff = 2, 8, 32, 64
    x = jax.random.normal(kx, (batch, seq, d_model), jnp.float32)
    w1, b1, w2, b2 = init_params(kp, d_model, d_ff, jnp.float32)

    x2d = x.reshape(batch * seq, d_model)
    out2d = feed_forward_pallas(x2d, w1, b1, w2, b2)
    out = out2d.reshape(batch, seq, d_model)
    jax.block_until_ready(out)

    ref = jnp.maximum(x2d @ w1 + b1, 0.0) @ w2 + b2
    assert jnp.allclose(out2d, ref, atol=1e-5, rtol=1e-5), "f32 mismatch vs reference"

    # ---- Test 2: bf16 MXU inputs, multi-tile reduction grid (accumulator) --
    batch2, seq2, d_model2, d_ff2 = 4, 128, 256, 1024
    x2 = jax.random.normal(kx2, (batch2, seq2, d_model2), jnp.float32)
    w1f, b1f, w2f, b2f = init_params(kp2, d_model2, d_ff2, jnp.float32)

    x2d2 = x2.reshape(batch2 * seq2, d_model2).astype(jnp.bfloat16)
    w1b = w1f.astype(jnp.bfloat16)
    w2b = w2f.astype(jnp.bfloat16)

    out2 = feed_forward_pallas(x2d2, w1b, b1f, w2b, b2f, tm=128, tf=256)
    jax.block_until_ready(out2)

    # Reference mimicking bf16 MXU inputs with f32 accumulation.
    hf = jnp.maximum(x2d2.astype(jnp.float32) @ w1b.astype(jnp.float32) + b1f, 0.0)
    ref2 = hf.astype(jnp.bfloat16).astype(jnp.float32) @ w2b.astype(jnp.float32) + b2f
    assert jnp.allclose(out2.astype(jnp.float32), ref2, atol=3e-2, rtol=3e-2), \
        "bf16 mismatch vs reference"

    # ---- Test 3: ragged row count (M=13) -> rows padded, result sliced -----
    x3 = jax.random.normal(kx3, (13, d_model), jnp.float32)
    out3 = feed_forward_pallas(x3, w1, b1, w2, b2)
    jax.block_until_ready(out3)
    ref3 = jnp.maximum(x3 @ w1 + b1, 0.0) @ w2 + b2
    assert out3.shape == (13, d_model)
    assert jnp.allclose(out3, ref3, atol=1e-5, rtol=1e-5), "ragged-M mismatch"

    print("KERNEL_OK")
</pallas_src>

<mosaic_0001>
module attributes {stable_mosaic.version = 11 : i64} {
  func.func @ffn_kernel_single(%arg0: i32, %arg1: memref<16x32xf32, #tpu.memory_space<vmem>>, %arg2: memref<32x64xf32, #tpu.memory_space<vmem>>, %arg3: memref<1x64xf32, #tpu.memory_space<vmem>>, %arg4: memref<64x32xf32, #tpu.memory_space<vmem>>, %arg5: memref<1x32xf32, #tpu.memory_space<vmem>>, %arg6: memref<16x32xf32, #tpu.memory_space<vmem>>) attributes {dimension_semantics = [#tpu.dimension_semantics<parallel>], iteration_bounds = array<i64: 1>, scalar_prefetch = 0 : i64, scratch_operands = 0 : i64, tpu.core_type = #tpu.core_type<tc>, window_params = [{transform_indices = @transform_0, window_bounds = array<i64: 16, 32>}, {pipeline_mode = #tpu.pipeline_mode<synchronous>, transform_indices = @transform_1, window_bounds = array<i64: 32, 64>}, {pipeline_mode = #tpu.pipeline_mode<synchronous>, transform_indices = @transform_2, window_bounds = array<i64: 1, 64>}, {pipeline_mode = #tpu.pipeline_mode<synchronous>, transform_indices = @transform_3, window_bounds = array<i64: 64, 32>}, {pipeline_mode = #tpu.pipeline_mode<synchronous>, transform_indices = @transform_4, window_bounds = array<i64: 1, 32>}, {transform_indices = @transform_5, window_bounds = array<i64: 16, 32>}]} {
    %c0 = arith.constant 0 : index
    %c0_0 = arith.constant 0 : index
    %0 = vector.load %arg1[%c0, %c0_0] : memref<16x32xf32, #tpu.memory_space<vmem>>, vector<16x32xf32>
    %c0_1 = arith.constant 0 : index
    %c0_2 = arith.constant 0 : index
    %1 = vector.load %arg2[%c0_1, %c0_2] : memref<32x64xf32, #tpu.memory_space<vmem>>, vector<32x64xf32>
    %cst = arith.constant dense<0.000000e+00> : vector<16x64xf32>
    %2 = tpu.matmul %0, %1, %cst {dimension_numbers = #tpu.dot_dimension_numbers<[1], [0], [0], [1], [0, 0, 1, 1], [], []>} : vector<16x32xf32>, vector<32x64xf32>, vector<16x64xf32> -> vector<16x64xf32>
    %c0_3 = arith.constant 0 : index
    %c0_4 = arith.constant 0 : index
    %3 = vector.load %arg3[%c0_3, %c0_4] : memref<1x64xf32, #tpu.memory_space<vmem>>, vector<1x64xf32>
    %4 = vector.broadcast %3 : vector<1x64xf32> to vector<16x64xf32>
    %5 = arith.addf %2, %4 : vector<16x64xf32>
    %cst_5 = arith.constant 0.000000e+00 : f32
    %6 = vector.broadcast %cst_5 : f32 to vector<16x64xf32>
    %7 = arith.maximumf %5, %6 : vector<16x64xf32>
    %c0_6 = arith.constant 0 : index
    %c0_7 = arith.constant 0 : index
    %8 = vector.load %arg4[%c0_6, %c0_7] : memref<64x32xf32, #tpu.memory_space<vmem>>, vector<64x32xf32>
    %cst_8 = arith.constant dense<0.000000e+00> : vector<16x32xf32>
    %9 = tpu.matmul %7, %8, %cst_8 {dimension_numbers = #tpu.dot_dimension_numbers<[1], [0], [0], [1], [0, 0, 1, 1], [], []>} : vector<16x64xf32>, vector<64x32xf32>, vector<16x32xf32> -> vector<16x32xf32>
    %c0_9 = arith.constant 0 : index
    %c0_10 = arith.constant 0 : index
    %10 = vector.load %arg5[%c0_9, %c0_10] : memref<1x32xf32, #tpu.memory_space<vmem>>, vector<1x32xf32>
    %11 = vector.broadcast %10 : vector<1x32xf32> to vector<16x32xf32>
    %12 = arith.addf %9, %11 : vector<16x32xf32>
    %c0_11 = arith.constant 0 : index
    %c0_12 = arith.constant 0 : index
    %13 = vector.load %arg6[%c0_11, %c0_12] : memref<16x32xf32, #tpu.memory_space<vmem>>, vector<16x32xf32>
    tpu.vector_store %arg6[%c0_11, %c0_12], %12 {strides = array<i32>} : memref<16x32xf32, #tpu.memory_space<vmem>>, vector<16x32xf32>,
    return
  }
  func.func @transform_0(%arg0: i32) -> (i32, i32) {
    %c0_i32 = arith.constant 0 : i32
    %c0_i32_0 = arith.constant 0 : i32
    return %arg0, %c0_i32 : i32, i32
  }
  func.func @transform_1(%arg0: i32) -> (i32, i32) {
    %c0_i32 = arith.constant 0 : i32
    %c0_i32_0 = arith.constant 0 : i32
    %c0_i32_1 = arith.constant 0 : i32
    return %c0_i32, %c0_i32_0 : i32, i32
  }
  func.func @transform_2(%arg0: i32) -> (i32, i32) {
    %c0_i32 = arith.constant 0 : i32
    %c0_i32_0 = arith.constant 0 : i32
    %c0_i32_1 = arith.constant 0 : i32
    return %c0_i32, %c0_i32_0 : i32, i32
  }
  func.func @transform_3(%arg0: i32) -> (i32, i32) {
    %c0_i32 = arith.constant 0 : i32
    %c0_i32_0 = arith.constant 0 : i32
    %c0_i32_1 = arith.constant 0 : i32
    return %c0_i32, %c0_i32_0 : i32, i32
  }
  func.func @transform_4(%arg0: i32) -> (i32, i32) {
    %c0_i32 = arith.constant 0 : i32
    %c0_i32_0 = arith.constant 0 : i32
    %c0_i32_1 = arith.constant 0 : i32
    return %c0_i32, %c0_i32_0 : i32, i32
  }
  func.func @transform_5(%arg0: i32) -> (i32, i32) {
    %c0_i32 = arith.constant 0 : i32
    %c0_i32_0 = arith.constant 0 : i32
    return %arg0, %c0_i32 : i32, i32
  }
}

</mosaic_0001>

<bundles_post_ra>
// kernel: tpu_custom_call.1
= control target key start
LH: loop header
LB: loop body
LE: loop exit
PB: predicated region body
PF: predicated region fallthrough
CT: control target
= control target key end

     0   :  { %vm34_vm0 = vcmask 261120   ;;  %s433_s0 = inlined_call_operand.vmem [shape: f32[16,32], index: 0, kind: input, shape index: {}]   ;;  %s434_s1 = inlined_call_operand.vmem [shape: f32[32,64], index: 1, kind: input, shape index: {}]   ;;  %s435_s2 = inlined_call_operand.vmem [shape: f32[1,64], index: 2, kind: input, shape index: {}]   ;;  %s436_s3 = inlined_call_operand.vmem [shape: f32[64,32], index: 3, kind: input, shape index: {}]   ;;  %s437_s4 = inlined_call_operand.vmem [shape: f32[1,32], index: 4, kind: input, shape index: {}]   ;;  %s438_s5 = inlined_call_operand.hbm [shape: f32[16,32], index: 5, kind: output, shape index: {}]  }
   0x1   :  { %v23_v0 = vld [vmem:[%s434_s1] sm:$0xff]  ;;  %v24_v1 = vld [vmem:[%s434_s1 + $0x8] sm:$0xff]  ;;  %v25_v2 = vld [vmem:[%s434_s1 + $0x10] sm:$0xff] }
   0x2   :  { %v285_v3 = vpack.c.bf16 %v24_v1, %v23_v0  ;;  %v26_v4 = vld [vmem:[%s434_s1 + $0x18] sm:$0xff]  ;;  %v21_v5 = vld [vmem:[%s433_s0] sm:$0xff]  ;;  %v119_v8 = vld [vmem:[%s436_s3 + $0x8] sm:$0xff] }
   0x3   :  { %v289_v6 = vpack.c.bf16 %v26_v4, %v25_v2  ;;  %263 = vmatprep.mubr.msk.f32.mxu0 %vm34_vm0, %v21_v5  ;;  %v118_v7 = vld [vmem:[%s436_s3] sm:$0xff]  ;;  %v120_v9 = vld [vmem:[%s436_s3 + $0x10] sm:$0xff]  ;;  %v121_v11 = vld [vmem:[%s436_s3 + $0x18] sm:$0xff] }
   0x4   :  { %286 = vmatprep.subr.bf16.mxu0 %v285_v3  ;;  %v293_v10 = vpack.c.bf16 %v119_v8, %v118_v7  ;;  %v297_v12 = vpack.c.bf16 %v121_v11, %v120_v9  ;;  %v122_v13 = vld [vmem:[%s436_s3 + $0x20] sm:$0xff]  ;;  %v123_v14 = vld [vmem:[%s436_s3 + $0x28] sm:$0xff] }
   0x5   :  { %288 = vmatpush3.bf16.msra.mxu0 %v285_v3 }
   0x6   :  { %10 = vsyncpa [#allocation3], 0  ;;  %290 = vmatprep.subr.bf16.mxu0 %v289_v6  ;;  %294 = vmatprep.subr.bf16.mxu1 %v293_v10  ;;  %v301_v15 = vpack.c.bf16 %v123_v14, %v122_v13  ;;  %v22_v16 = vld [vmem:[%s433_s0 + $0x8] sm:$0xff]  ;;  %v124_v17 = vld [vmem:[%s436_s3 + $0x30] sm:$0xff]  ;;  %vm133_vm1 = vcmask 523264  }
   0x7   :  { %296 = vmatpush3.bf16.msra.mxu1 %v293_v10  ;;  %v125_v18 = vld [vmem:[%s436_s3 + $0x38] sm:$0xff]  ;;  %v233_v20 = vld [vmem:[%s435_s2] ss:$0 sm:$0xff]  ;;  %s336_s3 = smov [#allocation2]  }
   0x8   :  { %298 = vmatprep.subr.bf16.mxu1 %v297_v12  ;;  %v305_v19 = vpack.c.bf16 %v125_v18, %v124_v17  ;;  %v236_v27 = vld [vmem:[%s437_s4] ss:$0 sm:$0xff]  ;;  %s222_s23 = sshll.u32 %s336_s3, 4  ;;  %s223_s23 = int_to_ptr.vmem [resolvable:$true] %s222_s23 }
   0x9   :  { %292 = vmatpush3.bf16.msra.mxu0 %v289_v6  ;;  %s312_s2 = scalar_lea.vmem %s223_s23, 256  ;;  %p317_p1 = scmp.lt.s32.totalorder %s223_s23, %s223_s23 }
   0xa   :  { %p313_p0 = scmp.ne.s32.totalorder %s223_s23, %s312_s2  ;;  %p318_p2 = scmp.lt.s32.totalorder %s312_s2, %s312_s2 }
   0xb   :  { %300 = vmatpush3.bf16.msra.mxu1 %v297_v12 }
   0xc   :  { %264 = vmatmul.mubr.msk.f32.vlgmr.msra.gmra.mrb[0].mxu0 %vm34_vm0, %v22_v16  ;;  %302 = vmatprep.subr.bf16.mxu1 %v301_v15  ;;  %p319_p3 = por %p318_p2, %p317_p1 }
   0xe   :  { %p320_p4 = pnand %p319_p3, %p313_p0 }
   0xf   :  { %304 = vmatpush3.bf16.msra.mxu1 %v301_v15 }
  0x10   :  { %306 = vmatprep.subr.bf16.mxu1 %v305_v19 }
  0x13   :  { %308 = vmatpush3.bf16.msra.mxu1 %v305_v19 }
  0xdf   :  { %v265_v21 = vpop.f32.mrb[0].mxu0 }
  0xe0   :  { %v113_v22 = vadd.f32 %v265_v21, %v233_v20  ;;  %v107_v23 = vpop.f32.mrb[1].mxu0 }
  0xe1   :  { %v108_v24 = vadd.f32 %v233_v20, %v107_v23 }
  0xe2   :  { %v117_v26 = vmax.f32 %v113_v22, 0.0 }
  0xe3   :  { %v116_v25 = vmax.f32 %v108_v24, 0.0 }
  0xe5   :  { %282 = vmatprep.mubr.msk.f32.mxu1 %vm133_vm1, %v116_v25 }
  0xe6   :  { %283 = vmatmul.mubr.msk.f32.vlgmr.msra.gmra.mrb[0].mxu1 %vm133_vm1, %v117_v26 }
 0x1b9   :  { %v284_v28 = vpop.f32.mrb[0].mxu1 }
 0x1ba   :  { %v212_v29 = vadd.f32 %v284_v28, %v236_v27  ;;  %v206_v30 = vpop.f32.mrb[1].mxu1 }
 0x1bb   :  { %v207_v31 = vadd.f32 %v236_v27, %v206_v30 }
 0x1bc   :  { %216 = vst.msk [vmem:[#allocation2 + $0x8] sm:$0xff] %vm34_vm0, %v212_v29 }
 0x1bd   :  { %215 = vst.msk [vmem:[#allocation2] sm:$0xff] %vm34_vm0, %v207_v31 }
 0x1be   :  { %323 = shalt.err (!%p320_p4)
}
 0x1bf   :  { %s324_s25 = scalar_lea.hbm %s438_s5, 256 }
 0x1c0   :  { %p325_p5 = scmp.ne.s32.totalorder %s438_s5, %s324_s25  ;;  %p328_p6 = scmp.lt.u32.totalorder %s324_s25, %s438_s5 }
 0x1c2   :  { %p330_p7 = pnand %p328_p6, %p325_p5 }
 0x1c4   :  { %333 = shalt.err (!%p330_p7)
}
 0x1c5   :  { %s337_s30 = smov 128   ;;  %s338_s6 = smov 8  }
 0x1c6   :  { %228 = dma.vmem_to_hbm [thread:$0]  %s223_s23, 256, %s438_s5, [#allocation3], %s337_s30, %s337_s30, %s338_s6  }
 0x1c7   :  { %334 = dma.done.wait [#allocation3], 256  }
 0x1c8   :  { %335 = vsyncadd [#allocation3], 4294967040 }
 0x1c9   :  { %232 = vsyncpa [#allocation3], 1 }

</bundles_post_ra>
